<compile_context>
chip_gen: v7x
topology: tpu7x:2x2x1
jax: 0.10.0
libtpu: 0.0.40
codegen_flags: <defaults>
</compile_context>

<pallas_src>
import jax
import jax.numpy as jnp
from jax.experimental import pallas as pl
from jax.experimental.pallas import tpu as pltpu


def _ae_kernel(xT_ref,
               w1_ref, b1_ref,
               w2_ref, b2_ref,
               w3_ref, b3_ref,
               w4t_ref, b4_ref,
               out_ref):
    xT = xT_ref[...]                                            # (in_dim, TB)

    # ---- encoder: Linear(input_dim -> 32) + ReLU (MXU, even for K == 1) ----
    h1 = jnp.dot(w1_ref[...], xT,
                 preferred_element_type=jnp.float32) + b1_ref[...]
    h1 = jnp.maximum(h1, 0.0)                                   # (32, TB)

    # ---- encoder: Linear(32 -> encoding_dim) (MXU) -------------------------
    z = jnp.dot(w2_ref[...], h1,
                preferred_element_type=jnp.float32) + b2_ref[...]   # (enc, TB)

    # ---- decoder: Linear(encoding_dim -> 32) + ReLU (MXU) ------------------
    h2 = jnp.dot(w3_ref[...], z,
                 preferred_element_type=jnp.float32) + b3_ref[...]  # (32, TB)
    h2 = jnp.maximum(h2, 0.0)

    # ---- decoder: Linear(32 -> input_dim) (MXU, even for N == 1) -----------
    # Contract the shared 32-dim (axis 0 of both operands) so the weight stays
    # in its (32, input_dim) layout: no in-kernel transpose.
    y = jax.lax.dot_general(w4t_ref[...], h2,
                            (((0,), (0,)), ((), ())),
                            preferred_element_type=jnp.float32) + b4_ref[...]

    out_ref[...] = y.astype(out_ref.dtype)                      # (in_dim, TB)


def _round_up(v, m):
    return ((v + m - 1) // m) * m


def mac_anomaly_detector(x, params, *, block_batch=32768, min_grid_steps=2):
    """Full autoencoder forward pass in one pipelined Pallas kernel.

    x: (B, input_dim) float32
    params: torch-Linear-style weights: W1 (32,in), b1 (32,), W2 (enc,32),
            b2 (enc,), W3 (32,enc), b3 (32,), W4 (in,32), b4 (in,).
    """
    B, input_dim = x.shape
    hidden = params["W1"].shape[0]
    enc = params["W2"].shape[0]

    # --- batch tile selection -------------------------------------------
    # Lane-dense (multiple of 128), as large as block_batch allows, but keep
    # >= min_grid_steps grid steps so v7x's two TensorCores both get work.
    TB = _round_up(pl.cdiv(B, min_grid_steps), 128)
    TB = min(TB, _round_up(block_batch, 128))
    TB = min(TB, _round_up(B, 128))          # never larger than the batch
    TB = max(TB, 128)
    grid = (pl.cdiv(B, TB),)                 # last step may be a partial block

    # --- lane-dense transposed layout (feature on sublanes, batch on lanes) -
    if input_dim == 1:
        xT = x.reshape(1, B)                 # zero-copy relayout of (B, 1)
    else:
        xT = x.T                             # one HBM pass; unavoidable here

    w1 = params["W1"]                        # (hidden, input_dim)
    b1c = params["b1"].reshape(hidden, 1)
    w2 = params["W2"]                        # (enc, hidden)
    b2c = params["b2"].reshape(enc, 1)
    w3 = params["W3"]                        # (hidden, enc)
    b3c = params["b3"].reshape(hidden, 1)
    w4t = params["W4"].T                     # (hidden, input_dim)
    b4c = params["b4"].reshape(input_dim, 1)

    args = (xT, w1, b1c, w2, b2c, w3, b3c, w4t, b4c)

    def x_map(i):
        return (0, i)

    def const_map(i):
        return (0, 0)

    in_specs = [pl.BlockSpec((input_dim, TB), x_map)]
    # Weights / biases: full-extent blocks, constant index map -> DMA'd once,
    # VMEM-resident across every grid step.
    in_specs += [pl.BlockSpec(a.shape, const_map) for a in args[1:]]
    out_spec = pl.BlockSpec((input_dim, TB), x_map)

    yT = pl.pallas_call(
        _ae_kernel,
        out_shape=jax.ShapeDtypeStruct((input_dim, B), jnp.float32),
        grid=grid,
        in_specs=in_specs,
        out_specs=out_spec,
        compiler_params=pltpu.CompilerParams(
            dimension_semantics=("parallel",),
            # Large TB temporaries blow past v5e's ~16 MiB scoped default;
            # 48 MiB stays under v7x's 64 MiB physical VMEM.
            vmem_limit_bytes=48 * 1024 * 1024),
    )(*args)

    if input_dim == 1:
        return yT.reshape(B, 1)              # zero-copy relayout back
    return yT.T


def init_params(key, input_dim=1, encoding_dim=8, hidden=32):
    """Deterministic torch-Linear-style init: W (out, in), b (out,)."""
    ks = jax.random.split(key, 8)

    def lin(kw, kb, fan_in, fan_out):
        bound = 1.0 / (fan_in ** 0.5)
        w = jax.random.uniform(kw, (fan_out, fan_in), jnp.float32, -bound, bound)
        b = jax.random.uniform(kb, (fan_out,), jnp.float32, -bound, bound)
        return w, b

    w1, b1 = lin(ks[0], ks[1], input_dim, hidden)       # encoder[0]
    w2, b2 = lin(ks[2], ks[3], hidden, encoding_dim)    # encoder[2]
    w3, b3 = lin(ks[4], ks[5], encoding_dim, hidden)    # decoder[0]
    w4, b4 = lin(ks[6], ks[7], hidden, input_dim)       # decoder[2]
    return dict(W1=w1, b1=b1, W2=w2, b2=b2, W3=w3, b3=b3, W4=w4, b4=b4)


def reference_forward(x, p):
    h1 = jnp.maximum(x @ p["W1"].T + p["b1"], 0.0)
    z = h1 @ p["W2"].T + p["b2"]
    h2 = jnp.maximum(z @ p["W3"].T + p["b3"], 0.0)
    return h2 @ p["W4"].T + p["b4"]


if __name__ == "__main__":
    key = jax.random.PRNGKey(0)
    k_x, k_p, k_x2, k_p2 = jax.random.split(key, 4)

    # Primary, module-consistent case: sequence of 300 scalar MAC values.
    # TB = 256 here -> 2 grid steps with a partial (44-column) final block, so
    # both the pipeline and the unpadded-edge path are exercised.
    B, input_dim, encoding_dim = 300, 1, 8
    x = jax.random.normal(k_x, (B, input_dim), jnp.float32)
    params = init_params(k_p, input_dim=input_dim, encoding_dim=encoding_dim)

    out = jax.block_until_ready(mac_anomaly_detector(x, params))
    ref = reference_forward(x, params)
    assert out.shape == (B, input_dim)
    assert jnp.allclose(out, ref, atol=1e-5, rtol=1e-5), "mismatch (input_dim=1)"

    # Secondary case: input_dim > 1 exercises the transposed-layout path.
    B2, d2 = 700, 3
    x2 = jax.random.normal(k_x2, (B2, d2), jnp.float32)
    p2 = init_params(k_p2, input_dim=d2, encoding_dim=encoding_dim)
    out2 = jax.block_until_ready(mac_anomaly_detector(x2, p2))
    assert out2.shape == (B2, d2)
    assert jnp.allclose(out2, reference_forward(x2, p2), atol=1e-5, rtol=1e-5), \
        "mismatch (input_dim=3)"

    print("KERNEL_OK")
</pallas_src>

<mosaic_0001>
module attributes {stable_mosaic.version = 11 : i64} {
  func.func @_ae_kernel(%arg0: i32, %arg1: memref<1x256xf32, #tpu.memory_space<vmem>>, %arg2: memref<32x1xf32, #tpu.memory_space<vmem>>, %arg3: memref<32x1xf32, #tpu.memory_space<vmem>>, %arg4: memref<8x32xf32, #tpu.memory_space<vmem>>, %arg5: memref<8x1xf32, #tpu.memory_space<vmem>>, %arg6: memref<32x8xf32, #tpu.memory_space<vmem>>, %arg7: memref<32x1xf32, #tpu.memory_space<vmem>>, %arg8: memref<32x1xf32, #tpu.memory_space<vmem>>, %arg9: memref<1x1xf32, #tpu.memory_space<vmem>>, %arg10: memref<1x256xf32, #tpu.memory_space<vmem>>) attributes {dimension_semantics = [#tpu.dimension_semantics<parallel>], iteration_bounds = array<i64: 2>, scalar_prefetch = 0 : i64, scratch_operands = 0 : i64, tpu.core_type = #tpu.core_type<tc>, window_params = [{transform_indices = @transform_0, window_bounds = array<i64: 1, 256>}, {pipeline_mode = #tpu.pipeline_mode<synchronous>, transform_indices = @transform_1, window_bounds = array<i64: 32, 1>}, {pipeline_mode = #tpu.pipeline_mode<synchronous>, transform_indices = @transform_2, window_bounds = array<i64: 32, 1>}, {pipeline_mode = #tpu.pipeline_mode<synchronous>, transform_indices = @transform_3, window_bounds = array<i64: 8, 32>}, {pipeline_mode = #tpu.pipeline_mode<synchronous>, transform_indices = @transform_4, window_bounds = array<i64: 8, 1>}, {pipeline_mode = #tpu.pipeline_mode<synchronous>, transform_indices = @transform_5, window_bounds = array<i64: 32, 8>}, {pipeline_mode = #tpu.pipeline_mode<synchronous>, transform_indices = @transform_6, window_bounds = array<i64: 32, 1>}, {pipeline_mode = #tpu.pipeline_mode<synchronous>, transform_indices = @transform_7, window_bounds = array<i64: 32, 1>}, {pipeline_mode = #tpu.pipeline_mode<synchronous>, transform_indices = @transform_8, window_bounds = array<i64: 1, 1>}, {transform_indices = @transform_9, window_bounds = array<i64: 1, 256>}]} {
    %c0 = arith.constant 0 : index
    %c0_0 = arith.constant 0 : index
    %0 = vector.load %arg1[%c0, %c0_0] : memref<1x256xf32, #tpu.memory_space<vmem>>, vector<1x256xf32>
    %c0_1 = arith.constant 0 : index
    %c0_2 = arith.constant 0 : index
    %1 = vector.load %arg2[%c0_1, %c0_2] : memref<32x1xf32, #tpu.memory_space<vmem>>, vector<32x1xf32>
    %cst = arith.constant dense<0.000000e+00> : vector<32x256xf32>
    %2 = tpu.matmul %1, %0, %cst {dimension_numbers = #tpu.dot_dimension_numbers<[1], [0], [0], [1], [0, 0, 1, 1], [], []>} : vector<32x1xf32>, vector<1x256xf32>, vector<32x256xf32> -> vector<32x256xf32>
    %c0_3 = arith.constant 0 : index
    %c0_4 = arith.constant 0 : index
    %3 = vector.load %arg3[%c0_3, %c0_4] : memref<32x1xf32, #tpu.memory_space<vmem>>, vector<32x1xf32>
    %4 = vector.broadcast %3 : vector<32x1xf32> to vector<32x256xf32>
    %5 = arith.addf %2, %4 : vector<32x256xf32>
    %cst_5 = arith.constant 0.000000e+00 : f32
    %6 = vector.broadcast %cst_5 : f32 to vector<32x256xf32>
    %7 = arith.maximumf %5, %6 : vector<32x256xf32>
    %c0_6 = arith.constant 0 : index
    %c0_7 = arith.constant 0 : index
    %8 = vector.load %arg4[%c0_6, %c0_7] : memref<8x32xf32, #tpu.memory_space<vmem>>, vector<8x32xf32>
    %cst_8 = arith.constant dense<0.000000e+00> : vector<8x256xf32>
    %9 = tpu.matmul %8, %7, %cst_8 {dimension_numbers = #tpu.dot_dimension_numbers<[1], [0], [0], [1], [0, 0, 1, 1], [], []>} : vector<8x32xf32>, vector<32x256xf32>, vector<8x256xf32> -> vector<8x256xf32>
    %c0_9 = arith.constant 0 : index
    %c0_10 = arith.constant 0 : index
    %10 = vector.load %arg5[%c0_9, %c0_10] : memref<8x1xf32, #tpu.memory_space<vmem>>, vector<8x1xf32>
    %11 = vector.broadcast %10 : vector<8x1xf32> to vector<8x256xf32>
    %12 = arith.addf %9, %11 : vector<8x256xf32>
    %c0_11 = arith.constant 0 : index
    %c0_12 = arith.constant 0 : index
    %13 = vector.load %arg6[%c0_11, %c0_12] : memref<32x8xf32, #tpu.memory_space<vmem>>, vector<32x8xf32>
    %cst_13 = arith.constant dense<0.000000e+00> : vector<32x256xf32>
    %14 = tpu.matmul %13, %12, %cst_13 {dimension_numbers = #tpu.dot_dimension_numbers<[1], [0], [0], [1], [0, 0, 1, 1], [], []>} : vector<32x8xf32>, vector<8x256xf32>, vector<32x256xf32> -> vector<32x256xf32>
    %c0_14 = arith.constant 0 : index
    %c0_15 = arith.constant 0 : index
    %15 = vector.load %arg7[%c0_14, %c0_15] : memref<32x1xf32, #tpu.memory_space<vmem>>, vector<32x1xf32>
    %16 = vector.broadcast %15 : vector<32x1xf32> to vector<32x256xf32>
    %17 = arith.addf %14, %16 : vector<32x256xf32>
    %cst_16 = arith.constant 0.000000e+00 : f32
    %18 = vector.broadcast %cst_16 : f32 to vector<32x256xf32>
    %19 = arith.maximumf %17, %18 : vector<32x256xf32>
    %c0_17 = arith.constant 0 : index
    %c0_18 = arith.constant 0 : index
    %20 = vector.load %arg8[%c0_17, %c0_18] : memref<32x1xf32, #tpu.memory_space<vmem>>, vector<32x1xf32>
    %cst_19 = arith.constant dense<0.000000e+00> : vector<1x256xf32>
    %21 = tpu.matmul %20, %19, %cst_19 {dimension_numbers = #tpu.dot_dimension_numbers<[0], [0], [1], [1], [0, 1, 1, 1], [], []>} : vector<32x1xf32>, vector<32x256xf32>, vector<1x256xf32> -> vector<1x256xf32>
    %c0_20 = arith.constant 0 : index
    %c0_21 = arith.constant 0 : index
    %22 = vector.load %arg9[%c0_20, %c0_21] : memref<1x1xf32, #tpu.memory_space<vmem>>, vector<1x1xf32>
    %23 = vector.broadcast %22 : vector<1x1xf32> to vector<1x256xf32>
    %24 = arith.addf %21, %23 : vector<1x256xf32>
    %c0_22 = arith.constant 0 : index
    %c0_23 = arith.constant 0 : index
    %25 = vector.load %arg10[%c0_22, %c0_23] : memref<1x256xf32, #tpu.memory_space<vmem>>, vector<1x256xf32>
    tpu.vector_store %arg10[%c0_22, %c0_23], %24 {strides = array<i32>} : memref<1x256xf32, #tpu.memory_space<vmem>>, vector<1x256xf32>,
    return
  }
  func.func @transform_0(%arg0: i32) -> (i32, i32) {
    %c0_i32 = arith.constant 0 : i32
    %c0_i32_0 = arith.constant 0 : i32
    return %c0_i32, %arg0 : i32, i32
  }
  func.func @transform_1(%arg0: i32) -> (i32, i32) {
    %c0_i32 = arith.constant 0 : i32
    %c0_i32_0 = arith.constant 0 : i32
    %c0_i32_1 = arith.constant 0 : i32
    return %c0_i32, %c0_i32_0 : i32, i32
  }
  func.func @transform_2(%arg0: i32) -> (i32, i32) {
    %c0_i32 = arith.constant 0 : i32
    %c0_i32_0 = arith.constant 0 : i32
    %c0_i32_1 = arith.constant 0 : i32
    return %c0_i32, %c0_i32_0 : i32, i32
  }
  func.func @transform_3(%arg0: i32) -> (i32, i32) {
    %c0_i32 = arith.constant 0 : i32
    %c0_i32_0 = arith.constant 0 : i32
    %c0_i32_1 = arith.constant 0 : i32
    return %c0_i32, %c0_i32_0 : i32, i32
  }
  func.func @transform_4(%arg0: i32) -> (i32, i32) {
    %c0_i32 = arith.constant 0 : i32
    %c0_i32_0 = arith.constant 0 : i32
    %c0_i32_1 = arith.constant 0 : i32
    return %c0_i32, %c0_i32_0 : i32, i32
  }
  func.func @transform_5(%arg0: i32) -> (i32, i32) {
    %c0_i32 = arith.constant 0 : i32
    %c0_i32_0 = arith.constant 0 : i32
    %c0_i32_1 = arith.constant 0 : i32
    return %c0_i32, %c0_i32_0 : i32, i32
  }
  func.func @transform_6(%arg0: i32) -> (i32, i32) {
    %c0_i32 = arith.constant 0 : i32
    %c0_i32_0 = arith.constant 0 : i32
    %c0_i32_1 = arith.constant 0 : i32
    return %c0_i32, %c0_i32_0 : i32, i32
  }
  func.func @transform_7(%arg0: i32) -> (i32, i32) {
    %c0_i32 = arith.constant 0 : i32
    %c0_i32_0 = arith.constant 0 : i32
    %c0_i32_1 = arith.constant 0 : i32
    return %c0_i32, %c0_i32_0 : i32, i32
  }
  func.func @transform_8(%arg0: i32) -> (i32, i32) {
    %c0_i32 = arith.constant 0 : i32
    %c0_i32_0 = arith.constant 0 : i32
    %c0_i32_1 = arith.constant 0 : i32
    return %c0_i32, %c0_i32_0 : i32, i32
  }
  func.func @transform_9(%arg0: i32) -> (i32, i32) {
    %c0_i32 = arith.constant 0 : i32
    %c0_i32_0 = arith.constant 0 : i32
    return %c0_i32, %arg0 : i32, i32
  }
}

</mosaic_0001>

<bundles_post_ra>
// kernel: tpu_custom_call.1
= control target key start
LH: loop header
LB: loop body
LE: loop exit
PB: predicated region body
PF: predicated region fallthrough
CT: control target
= control target key end

     0   :  { %s1359_s0 = inlined_call_operand.vmem [shape: f32[1,300], index: 0, kind: input, shape index: {}]   ;;  %s1360_s1 = inlined_call_operand.vmem [shape: f32[32,1], index: 1, kind: input, shape index: {}]   ;;  %s1361_s2 = inlined_call_operand.vmem [shape: f32[32,1], index: 2, kind: input, shape index: {}]   ;;  %s1362_s3 = inlined_call_operand.vmem [shape: f32[8,32], index: 3, kind: input, shape index: {}]   ;;  %s1363_s4 = inlined_call_operand.vmem [shape: f32[8,1], index: 4, kind: input, shape index: {}]   ;;  %s1364_s5 = inlined_call_operand.vmem [shape: f32[32,8], index: 5, kind: input, shape index: {}]   ;;  %s1365_s6 = inlined_call_operand.vmem [shape: f32[32,1], index: 6, kind: input, shape index: {}]   ;;  %s1366_s7 = inlined_call_operand.vmem [shape: f32[32,1], index: 7, kind: input, shape index: {}]   ;;  %s1367_s8 = inlined_call_operand.<no memory space> [shape: f32[1,1], index: 8, kind: input, shape index: {}]   ;;  %s1368_s9 = inlined_call_operand.hbm [shape: f32[1,300], index: 9, kind: output, shape index: {}]  }
   0x1   :  { %v14_v0 = vstv %s1367_s8 }
   0x2   :  { %15 = vst [vmem:[#allocation2] sm:$0x1] %v14_v0 }
   0x3   :  { %16 = vsyncpa [#allocation4], 0 }
   0x4   :  { %18 = vsyncpa [#allocation4 + $0x1], 0  ;;  %s1155_s11 = smov 0   ;;  %s1157_s12 = smov 0  }
   0x5   :  { %s1159_s13 = smov 0   ;;  %s1161_s14 = smov 0  }
   0x6 LB: > { %s1176_s8 = sadd.s32 4294967295, %s1096_s14   ;;  %s949_s15 = sadd.s32 4294967294, %s1096_s14   ;;  %s1096_s14 = sphi %s1161_s14, %s1374_s14   ;;  %s1092_s13 = sphi %s1159_s13, %s1373_s13   ;;  %s1088_s12 = sphi %s1157_s12, %s1372_s12   ;;  %s1084_s11 = sphi %s1155_s11, %s1371_s11  }
   0x7   : > { %s1180_s16 = sadd.s32 1, %s1096_s14   ;;  %s225_s17 = sadd.s32 1, %s1092_s13 }
   0x8   : > { %s222_s18 = ssub.s32 %s1096_s14, %s1180_s16  ;;  %p235_p0 = scmp.ne.s32.totalorder %s1092_s13, %s1088_s12 }
   0x9   : > { %p223_p1 = scmp.eq.s32.totalorder %s222_s18, 0  ;;  %p236_p2 = scmp.eq.s32.totalorder %s1176_s8, 1 }
   0xa   : > { %p241_p3 = scmp.ne.s32.totalorder %s1088_s12, %s1084_s11  ;;  %p242_p4 = scmp.eq.s32.totalorder %s949_s15, 1 }
   0xb   : > { %s1191_s19 = scalar_select %p223_p1, %s1092_s13, %s225_s17  }
   0xc   : > { %p1193_p5 = por %p236_p2, %p235_p0  ;;  %p1197_p6 = por %p242_p4, %p241_p3 }
   0xd   : > { %p952_p7 = scmp.ge.s32.totalorder %s1096_s14, 1  ;;  %p300_p8 = scmp.lt.s32.totalorder %s1096_s14, 3 }
   0xf   : > { %p301_p9 = pnand %p952_p7, %p300_p8 }
  0x10   : > { %s1204_s22 = sshll.u32 (!%p301_p9), %s1176_s8, 1  ;;  %v387_v1 = vlaneseq (!%p301_p9)  ;;  %v1098_v2 = vmov (!%p301_p9), 0.0   ;;  %v362_v3 = vld [vmem:[%s1361_s2] sm:$0xff] (!%p301_p9)  ;;  %v1099_v5 = vmov (!%p301_p9), 0   ;;  %v364_v6 = vld [vmem:[%s1361_s2 + $0x10] sm:$0xff] (!%p301_p9)  ;;  %v363_v9 = vld [vmem:[%s1361_s2 + $0x8] sm:$0xff] (!%p301_p9) }
  0x11   : > { %304 = sbr.rel (%p301_p9) target bundleno = 968 (0x3c8), region = 56  ;;  %p344_p10 = scmp.lt.s32.totalorder (!%p301_p9), %s1204_s22, 2  ;;  %477 = vmatprep.mubr.f32.mxu0 (!%p301_p9), %v1098_v2  ;;  %585 = vmatprep.mubr.f32.mxu1 (!%p301_p9), %v1098_v2  ;;  %v365_v10 = vld [vmem:[%s1361_s2 + $0x18] sm:$0xff] (!%p301_p9)  ;;  %vm408_vm0 = vcmask (!%p301_p9), 1040384   ;;  %v358_v14 = vld [vmem:[%s1360_s1] sm:$0xff] (!%p301_p9)  ;;  %vm395_vm1 = vcmask (!%p301_p9), 7168  }
  0x12   : > { %v1213_v4 = vshrl.u32 (!%p301_p9), %v387_v1, 7  ;;  %1032 = vset.pattern.permute.xlu0 (!%p301_p9), %v1099_v5  ;;  %1033 = vset.pattern.permute.xlu1 (!%p301_p9), %v1099_v5  ;;  %v511_v15 = vld [vmem:[%s1363_s4] sm:$0xff] (!%p301_p9)  ;;  %v359_v17 = vld [vmem:[%s1360_s1 + $0x8] sm:$0xff] (!%p301_p9)  ;;  %v598_v19 = vld [vmem:[%s1365_s6 + $0x10] sm:$0xff] (!%p301_p9)  ;;  %vm517_vm2 = vcmask (!%p301_p9), 261120   ;;  %vm620_vm3 = vcmask (!%p301_p9), 64512  }
  0x13   : > { %368 = vperm.xlu0 (!%p301_p9), %1032, %v362_v3   ;;  %378 = vperm.xlu1 (!%p301_p9), %1033, %v364_v6   ;;  %v596_v16 = vld [vmem:[%s1365_s6] sm:$0xff] (!%p301_p9)  ;;  %v597_v18 = vld [vmem:[%s1365_s6 + $0x8] sm:$0xff] (!%p301_p9)  ;;  %v360_v20 = vld [vmem:[%s1360_s1 + $0x10] sm:$0xff] (!%p301_p9)  ;;  %s336_s23 = sand.u32 (!%p301_p9), 1, %s1088_s12   ;;  %vm870_vm4 = vcmp.lt.s32.totalorder (!%p301_p9), %v387_v1, 256 }
  0x14   : > { %v389_v7 = vsub.s32 (!%p301_p9), 0, %v1213_v4  ;;  %v393_v8 = vsub.s32 (!%p301_p9), 1, %v1213_v4  ;;  %v599_v21 = vld [vmem:[%s1365_s6 + $0x18] sm:$0xff] (!%p301_p9)  ;;  %v734_v23 = vld [vmem:[#allocation2] sm:$0x1] (!%p301_p9)  ;;  %v731_v58 = vld [vmem:[%s1366_s7 + $0x8] sm:$0xff] (!%p301_p9) }
  0x15   : > { %v361_v22 = vld [vmem:[%s1360_s1 + $0x18] sm:$0xff] (!%p301_p9)  ;;  %v510_v56 = vld [vmem:[%s1362_s3] sm:$0xff] (!%p301_p9)  ;;  %v732_v59 = vld [vmem:[%s1366_s7 + $0x10] sm:$0xff] (!%p301_p9)  ;;  %s953_s24 = sshll.u32 (!%p301_p9), %s336_s23, 1  ;;  %s1305_s26 = scalar_lea.sflag (!%p301_p9), [#allocation4], %s336_s23 }
  0x16   : > { %v730_v57 = vld [vmem:[%s1366_s7] sm:$0xff] (!%p301_p9)  ;;  %v733_v60 = vld [vmem:[%s1366_s7 + $0x18] sm:$0xff] (!%p301_p9)  ;;  %v593_v6 = vld [vmem:[%s1364_s5 + $0x8] sm:$0xff] (!%p301_p9)  ;;  %s338_s25 = scalar_lea.vmem (!%p301_p9), [#allocation3], %s953_s24 }
  0x17   : > { %373 = vperm.xlu0 (!%p301_p9), %1032, %v363_v9   ;;  %383 = vperm.xlu1 (!%p301_p9), %1033, %v365_v10   ;;  %v592_v5 = vld [vmem:[%s1364_s5] sm:$0xff] (!%p301_p9)  ;;  %v595_v9 = vld [vmem:[%s1364_s5 + $0x18] sm:$0xff] (!%p301_p9) }
  0x18   : > { %s345_s27 = scalar_select %p344_p10, %s1204_s22, 2 }
  0x19   : > { %s882_s28 = ssub.s32 (%p1193_p5), 3, %s1204_s22 }
  0x1a   : > { %s346_s18 = scalar_lea.vmem %s1359_s0, %s345_s27  ;;  %p883_p11 = scmp.lt.s32.totalorder (%p1193_p5), %s882_s28, 2 }
  0x1b   : > { %v357_v11 = vld [vmem:[%s346_s18] sm:$0x3]  ;;  %514 = vperm.xlu0 %1032, %v511_v15   ;;  %602 = vperm.xlu1 %1033, %v596_v16  }
  0x1c   : > { %v390_v12 = vrot.slane %v357_v11, %v389_v7  ;;  %v394_v13 = vrot.slane %v357_v11, %v393_v8  ;;  %v594_v8 = vld [vmem:[%s1364_s5 + $0x10] sm:$0xff] }
  0x1e   : > { %955 = vmatprep.subr.msk.mxu0 %vm408_vm0, %v394_v13 }
  0x1f   : > { %956 = vmatpush1.msk.msra.mxu0 %vm408_vm0, %v390_v12  ;;  %607 = vperm.xlu0 %1032, %v597_v18  }
  0x20   : > { %957 = vmatmul.mubr.msk.f32.vlgmr.msra.gmra.mrb[0].mxu0 %vm395_vm1, %v358_v14  ;;  %612 = vperm.xlu1 %1033, %v598_v19  }
  0x21   : > { %483 = vmatprep.mubr.f32.mxu0 %v1098_v2 }
  0x23   : > { %617 = vperm.xlu0 %1032, %v599_v21  }
  0x24   : > { %958 = vmatmul.mubr.msk.f32.gmra.mrb[2].mxu0 %vm395_vm1, %v359_v17 }
  0x25   : > { %489 = vmatprep.mubr.f32.mxu0 %v1098_v2 }
  0x27   : > { %737 = vperm.xlu0 %1032, %v734_v23  }
  0x28   : > { %959 = vmatmul.mubr.msk.f32.gmra.mrb[4].mxu0 %vm395_vm1, %v360_v20 }
  0x29   : > { %495 = vmatprep.mubr.f32.mxu0 %v1098_v2 }
  0x2c   : > { %960 = vmatmul.mubr.msk.f32.gmra.mrb[6].mxu0 %vm395_vm1, %v361_v22 }
  0x2d   : > { %843 = vmatprep.mubr.f32.mxu0 %v1098_v2 }
  0x49   : > { %744 = vxpose.xlu1.b32.start [1/4] (short) (narrow) %v730_v57, 8 }
  0x4d   : > { %745 = vxpose.xlu1.b32.cont [2/4] (short) (narrow) %v731_v58, 8 }
  0x51   : > { %746 = vxpose.xlu1.b32.cont [3/4] (short) (narrow) %v732_v59, 8 }
  0x55   : > { %747 = vxpose.xlu1.b32.end [4/4] (short) (narrow) %v733_v60, 8 }
  0x92   : > { %v369_v24 = vpop.permute.xlu0 %368  ;;  %v379_v33 = vpop.permute.xlu1 %378 }
  0x96   : > { %v374_v28 = vpop.permute.xlu0 %373  ;;  %v384_v44 = vpop.permute.xlu1 %383 }
  0x9a   : > { %v515_v62 = vpop.permute.xlu0 %514  ;;  %v603_v12 = vpop.permute.xlu1 %602 }
  0x9e   : > { %v608_v14 = vpop.permute.xlu0 %607 }
  0xf3   : > { %v479_v25 = vpop.f32.mrb[0].mxu0 }
  0xf4   : > { %v481_v26 = vpop.f32.mrb[1].mxu0  ;;  %v480_v27 = vadd.f32 %v479_v25, %v369_v24 }
  0xf5   : > { %v482_v29 = vadd.f32 %v481_v26, %v369_v24  ;;  %v613_v26 = vpop.permute.xlu1 %612 }
  0xf6   : > { %v502_v35 = vmax.f32 %v480_v27, 0.0 }
  0xf7   : > { %v485_v30 = vpop.f32.mrb[2].mxu0  ;;  %v503_v37 = vmax.f32 %v482_v29, 0.0  ;;  %v618_v29 = vpop.permute.xlu0 %617 }
  0xf8   : > { %v486_v31 = vadd.f32 %v485_v30, %v374_v28  ;;  %v487_v32 = vpop.f32.mrb[3].mxu0 }
  0xf9   : > { %v488_v34 = vadd.f32 %v487_v32, %v374_v28 }
  0xfa   : > { %v504_v36 = vmax.f32 %v486_v31, 0.0 }
  0xfb   : > { %v505_v38 = vmax.f32 %v488_v34, 0.0  ;;  %v491_v39 = vpop.f32.mrb[4].mxu0 }
  0xfc   : > { %v493_v40 = vpop.f32.mrb[5].mxu0  ;;  %v977_v41 = vpack.c.bf16 %v504_v36, %v502_v35  ;;  %v492_v43 = vadd.f32 %v491_v39, %v379_v33 }
  0xfd   : > { %v975_v42 = vpack.c.bf16 %v505_v38, %v503_v37  ;;  %v494_v45 = vadd.f32 %v493_v40, %v379_v33 }
  0xfe   : > { %v506_v50 = vmax.f32 %v492_v43, 0.0 }
  0xff   : > { %v497_v46 = vpop.f32.mrb[6].mxu0  ;;  %976 = vmatprep.subr.bf16.mxu1 %v975_v42  ;;  %v507_v52 = vmax.f32 %v494_v45, 0.0  ;;  %v1100_v42 = vmov 1966171168  }
 0x100   : > { %v498_v47 = vadd.f32 %v497_v46, %v384_v44  ;;  %v499_v48 = vpop.f32.mrb[7].mxu0  ;;  %978 = vmatpush1.bf16.msra.mxu1 %v977_v41  ;;  %v760_v41 = vpop.trf.xlu1  ;;  %v854_v43 = vunpack.c.l.s4 %v1100_v42 }
 0x101   : > { %v500_v49 = vadd.f32 %v499_v48, %v384_v44  ;;  %v738_v44 = vpop.permute.xlu0 %737 }
 0x102   : > { %v508_v51 = vmax.f32 %v498_v47, 0.0  ;;  %v855_v45 = vunpack.c.0.s8 %v854_v43  ;;  %v743_v46 = vrot.slane %v738_v44, %v389_v7 }
 0x103   : > { %v509_v53 = vmax.f32 %v500_v49, 0.0 }
 0x104   : > { %v981_v54 = vpack.c.bf16 %v508_v51, %v506_v50  ;;  %v858_v51 = vsub.s32 %v855_v45, %v1213_v4 }
 0x105   : > { %v979_v55 = vpack.c.bf16 %v509_v53, %v507_v52 }
 0x107   : > { %980 = vmatprep.subr.bf16.mxu1 %v979_v55 }
 0x108   : > { %982 = vmatpush1.bf16.msra.mxu1 %v981_v54 }
 0x10b   : > { %961 = vmatmul.mubr.msk.f32.vlgmr.msra.gmra.mrb[0].mxu1 %vm517_vm2, %v510_v56 }
 0x10c   : > { %697 = vmatprep.mubr.f32.mxu1 %v1098_v2 }
 0x1de   : > { %v587_v61 = vpop.f32.mrb[0].mxu1 }
 0x1df   : > { %v589_v63 = vpop.f32.mrb[1].mxu1  ;;  %v588_v3 = vadd.f32 %v587_v61, %v515_v62 }
 0x1e0   : > { %v590_v0 = vadd.f32 %v589_v63, %v515_v62 }
 0x1e2   : > { %633 = vmatprep.subr.mxu1 %v590_v0 }
 0x1e3   : > { %634 = vmatpush1.msra.mxu1 %v588_v3 }
 0x1e4   : > { %962 = vmatmul.mubr.msk.f32.vlgmr.msra.gmra.mrb[2].mxu1 %vm620_vm3, %v592_v5 }
 0x1e5   : > { %703 = vmatprep.mubr.f32.mxu1 %v1098_v2 }
 0x1e8   : > { %963 = vmatmul.mubr.msk.f32.gmra.mrb[4].mxu1 %vm620_vm3, %v593_v6 }
 0x1e9   : > { %709 = vmatprep.mubr.f32.mxu1 %v1098_v2 }
 0x1ec   : > { %964 = vmatmul.mubr.msk.f32.gmra.mrb[6].mxu1 %vm620_vm3, %v594_v8 }
 0x1ed   : > { %715 = vmatprep.mubr.f32.mxu1 %v1098_v2 }
 0x1f0   : > { %965 = vmatmul.mubr.msk.f32.gmra.mrb[8].mxu1 %vm620_vm3, %v595_v9 }
 0x2b7   : > { %v699_v10 = vpop.f32.mrb[2].mxu1 }
 0x2b8   : > { %v701_v11 = vpop.f32.mrb[3].mxu1  ;;  %v700_v13 = vadd.f32 %v699_v10, %v603_v12 }
 0x2b9   : > { %v702_v15 = vadd.f32 %v701_v11, %v603_v12 }
 0x2ba   : > { %v722_v20 = vmax.f32 %v700_v13, 0.0 }
 0x2bb   : > { %v705_v16 = vpop.f32.mrb[4].mxu1  ;;  %v723_v22 = vmax.f32 %v702_v15, 0.0 }
 0x2bc   : > { %v706_v17 = vadd.f32 %v705_v16, %v608_v14  ;;  %v707_v18 = vpop.f32.mrb[5].mxu1 }
 0x2bd   : > { %v708_v19 = vadd.f32 %v707_v18, %v608_v14 }
 0x2be   : > { %v724_v21 = vmax.f32 %v706_v17, 0.0 }
 0x2bf   : > { %v725_v23 = vmax.f32 %v708_v19, 0.0  ;;  %v711_v2 = vpop.f32.mrb[6].mxu1 }
 0x2c0   : > { %v985_v24 = vpack.c.bf16 %v724_v21, %v722_v20  ;;  %v713_v25 = vpop.f32.mrb[7].mxu1  ;;  %v712_v28 = vadd.f32 %v711_v2, %v613_v26 }
 0x2c1   : > { %v983_v27 = vpack.c.bf16 %v725_v23, %v723_v22  ;;  %v714_v30 = vadd.f32 %v713_v25, %v613_v26 }
 0x2c2   : > { %v726_v35 = vmax.f32 %v712_v28, 0.0 }
 0x2c3   : > { %v717_v31 = vpop.f32.mrb[8].mxu1  ;;  %984 = vmatprep.subr.bf16.mxu0 %v983_v27  ;;  %v727_v37 = vmax.f32 %v714_v30, 0.0 }
 0x2c4   : > { %v718_v32 = vadd.f32 %v717_v31, %v618_v29  ;;  %v719_v33 = vpop.f32.mrb[9].mxu1  ;;  %986 = vmatpush1.bf16.msra.mxu0 %v985_v24 }
 0x2c5   : > { %v720_v34 = vadd.f32 %v719_v33, %v618_v29 }
 0x2c6   : > { %v728_v36 = vmax.f32 %v718_v32, 0.0 }
 0x2c7   : > { %v729_v38 = vmax.f32 %v720_v34, 0.0 }
 0x2c8   : > { %v989_v39 = vpack.c.bf16 %v728_v36, %v726_v35 }
 0x2c9   : > { %v987_v40 = vpack.c.bf16 %v729_v38, %v727_v37 }
 0x2cb   : > { %988 = vmatprep.subr.bf16.mxu0 %v987_v40 }
 0x2cc   : > { %990 = vmatpush1.bf16.msra.mxu0 %v989_v39 }
 0x2cf   : > { %966 = vmatmul.mubr.msk.f32.vlgmr.msra.gmra.mrb[8].mxu0 %vm517_vm2, %v760_v41 }
 0x3a2   : > { %v845_v47 = vpop.f32.mrb[8].mxu0 }
 0x3a3   : > { %v846_v48 = vadd.f32 %v845_v47, %v743_v46  ;;  %v847_v49 = vpop.f32.mrb[9].mxu0 }
 0x3a4   : > { %v848_v50 = vadd.f32 %v847_v49, %v743_v46 }
 0x3a6   : > { %v852_v52 = vcombine.low %v846_v48, %v848_v50  ;;  %880 = sbr.rel (!%p1193_p5) target bundleno = 968 (0x3c8), region = 60 }
 0x3a8   : > { %v859_v53 = vrot.slane %v852_v52, %v858_v51 }
 0x3aa   : > { %v866_v54 = vrot.slane %v859_v53, %v858_v51 }
 0x3ac   : > { %872 = vst.msk [vmem:[%s338_s25] sm:$0x3] %vm870_vm4, %v866_v54 }
 0x3ad   : > { %s1376_s28 = smov (!%p883_p11, %s882_s28), 2 }
 0x3ae   : > { %s1310_s27 = sshll.u32 %s1376_s28, 4 }
 0x3af   : > { %s887_s29 = ssub.s32 32, %s1310_s27 }
 0x3b0   : > { %888 = vsyncadd %s1305_s26, %s887_s29  ;;  %p970_p12 = scmp.ne.s32.totalorder %s1310_s27, 0  ;;  %s974_s30 = sshll.u32 %s1176_s8, 5 }
 0x3b1   : > { %s1319_s20 = scalar_lea.hbm %s1368_s9, %s974_s30  ;;  %s893_s17 = sshll.u32 %s338_s25, 4  ;;  %s894_s17 = int_to_ptr.vmem [resolvable:$true] %s893_s17 }
 0x3b2   : > { %s1034_s22 = scalar_lea.vmem %s894_s17, %s1310_s27  ;;  %s1101_s18 = smov [#allocation3]  }
 0x3b3   : > { %p1035_p13 = scmp.ne.s32.totalorder %s894_s17, %s1034_s22  ;;  %s1038_s23 = sshll.u32 %s1101_s18, 4  ;;  %s1039_s23 = int_to_ptr.vmem [resolvable:$false] %s1038_s23 }
 0x3b4   : > { %s1040_s24 = scalar_lea.vmem %s1039_s23, 64  ;;  %p1041_p2 = scmp.lt.s32.totalorder %s894_s17, %s1039_s23 }
 0x3b5   : > { %p1036_p0 = pnand %p1035_p13, %p970_p12  ;;  %p1042_p3 = scmp.lt.s32.totalorder %s1040_s24, %s1034_s22 }
 0x3b7   : > { %p1037_p1 = pneg %p1036_p0  ;;  %p1043_p4 = por %p1042_p3, %p1041_p2 }
 0x3b9   : > { %p1044_p5 = pnand %p1043_p4, %p1037_p1 }
 0x3bb   : > { %1047 = shalt.err (!%p1044_p5)
}
 0x3bc   : > { %s1048_s8 = scalar_lea.hbm %s1319_s20, %s1310_s27  ;;  %s1052_s29 = scalar_lea.hbm %s1368_s9, 48 }
 0x3bd   : > { %p1049_p7 = scmp.ne.s32.totalorder %s1319_s20, %s1048_s8  ;;  %p1053_p10 = scmp.lt.u32.totalorder %s1319_s20, %s1368_s9 }
 0x3be   : > { %p1054_p11 = scmp.lt.u32.totalorder %s1052_s29, %s1048_s8  ;;  %p1056_p0 = scmp.lt.u32.totalorder %s1048_s8, %s1319_s20 }
 0x3bf   : > { %p1050_p8 = pnand %p1049_p7, %p970_p12 }
 0x3c0   : > { %p1055_p13 = por %p1054_p11, %p1053_p10 }
 0x3c1   : > { %p1051_p9 = pneg %p1050_p8 }
 0x3c2   : > { %p1057_p1 = por %p1056_p0, %p1055_p13 }
 0x3c4   : > { %p1058_p2 = pnand %p1057_p1, %p1051_p9 }
 0x3c6   : > { %1061 = shalt.err (!%p1058_p2)
}
 0x3c7   : > { %896 = dma.vmem_to_hbm [thread:$0]  (%p970_p12), %s894_s17, %s1310_s27, %s1319_s20, %s1305_s26  }
 0x3c8 PF: > { %p996_p3 = scmp.ge.s32.totalorder %s1096_s14, 2  ;;  %s905_s15 = sand.u32 1, %s1084_s11  }
 0x3c9   : > { %s906_s22 = scalar_lea.sflag [#allocation4], %s905_s15 }
 0x3ca   : > { %p993_p4 = pnand %p996_p3, %p1197_p6 }
 0x3cc   : > { %1079 = dma.done.wait (!%p993_p4), %s906_s22, 32  }
 0x3cd   : > { %1081 = vsyncadd (!%p993_p4), %s906_s22, 4294967264  ;;  %p21_p5 = scmp.ge.s32.totalorder %s1180_s16, 4   ;;  %s1371_s11 = smov %s1088_s12 }
 0x3ce   : > { %s1372_s12 = smov %s1092_s13  ;;  %s1373_s13 = smov %s1191_s19 }
 0x3cf   : > { %s1374_s14 = smov %s1180_s16  ;;  %23 = sbr.rel (!%p21_p5) target bundleno = 6 (0x6), region = 91 }
 0x3d6   :  { %911 = vsyncpa [#allocation4], 1 }
 0x3d7   :  { %913 = vsyncpa [#allocation4 + $0x1], 1 }

</bundles_post_ra>
